<compile_context>
chip_gen: v5e
topology: v5e:2x2
jax: 0.10.0
libtpu: 0.0.40
codegen_flags: <defaults>
</compile_context>

<pallas_src>
import functools

import jax
import jax.numpy as jnp
from jax.experimental import pallas as pl
from jax.experimental.pallas import tpu as pltpu


def _span_marker_kernel(D, h_ref, st_ref, en_ref,
                        w1_ref, b1_ref,
                        w2s_ref, b2s_ref, w2e_ref, b2e_ref,
                        wos_ref, woe_ref, bo_ref,
                        o_ref,
                        srep_ref, erep_ref):
    """One grid step = (batch b, K-tile kt)."""
    kt = pl.program_id(1)
    L = h_ref.shape[1]
    TK = st_ref.shape[2]

    # ---- per-batch projections, computed once per batch (kt == 0) --------------
    @pl.when(kt == 0)
    def _():
        h = h_ref[0].astype(jnp.bfloat16)                         # (L, D) bf16 MXU feed
        # Fused layer-1 for both projections: [W1_start | W1_end] -> (L, 4D).
        y = jnp.dot(h, w1_ref[...], preferred_element_type=jnp.float32) + b1_ref[...]
        y = jnp.maximum(y, 0.0).astype(jnp.bfloat16)              # ReLU (dropout = identity)
        hs = y[:, :2 * D]
        he = y[:, 2 * D:]
        srep = jnp.dot(hs, w2s_ref[...], preferred_element_type=jnp.float32) + b2s_ref[...]
        erep = jnp.dot(he, w2e_ref[...], preferred_element_type=jnp.float32) + b2e_ref[...]
        srep_ref[...] = srep.astype(srep_ref.dtype)
        erep_ref[...] = erep.astype(erep_ref.dtype)

    # ---- extract_elements for this K-tile: (TK, L) one-hot x (L, D) reps -------
    # One-hot rides the MXU in its canonical orientation; 0/1 is exact in bf16.
    # Note: out-of-range indices produce zero rows (original torch.gather would
    # error); demo / production indices are assumed to be in [0, L).
    st = st_ref[0, 0]                                             # (TK, 1) int32
    en = en_ref[0, 0]                                             # (TK, 1) int32
    col = jax.lax.broadcasted_iota(jnp.int32, (TK, L), 1)
    oh_s = (col == st).astype(jnp.bfloat16)                       # (TK, L)
    oh_e = (col == en).astype(jnp.bfloat16)
    s_span = jnp.dot(oh_s, srep_ref[...], preferred_element_type=jnp.float32)  # (TK, D)
    e_span = jnp.dot(oh_e, erep_ref[...], preferred_element_type=jnp.float32)

    # ---- cat([start, end], -1).relu() @ Wo + bo (concat folded into split matmuls)
    s_act = jnp.maximum(s_span, 0.0).astype(jnp.bfloat16)
    e_act = jnp.maximum(e_span, 0.0).astype(jnp.bfloat16)
    out = (jnp.dot(s_act, wos_ref[...], preferred_element_type=jnp.float32)
           + jnp.dot(e_act, woe_ref[...], preferred_element_type=jnp.float32)
           + bo_ref[...])
    o_ref[0] = out.astype(o_ref.dtype)


def _pick_tile_k(K):
    # Largest multiple-of-8 divisor of K that is <= 512; fall back to K itself.
    for tk in range(min(K, 512), 0, -1):
        if K % tk == 0 and (tk % 8 == 0 or tk == K):
            return tk
    return K


def span_marker_forward(h, span_idx, params, max_width, tile_k=None):
    B, L, D = h.shape
    K = span_idx.shape[1]
    assert K == L * max_width, "span_idx.shape[1] must equal L * max_width"
    if tile_k is None:
        tile_k = _pick_tile_k(K)
    assert K % tile_k == 0, "tile_k must divide K"
    nkt = K // tile_k

    # Indices as (B, nkt, TK, 1): the last two block dims equal the full dims
    # (layout-clean) and (TK, 1) is already in the sublane orientation the
    # one-hot compare needs (no in-kernel transpose).
    starts = span_idx[:, :, 0].astype(jnp.int32).reshape(B, nkt, tile_k, 1)
    ends = span_idx[:, :, 1].astype(jnp.int32).reshape(B, nkt, tile_k, 1)

    w1s, b1s, w2s, b2s, w1e, b1e, w2e, b2e, wo, bo = params
    bf16 = jnp.bfloat16
    # Fused layer-1 weight/bias; all matmul weights cast to bf16 once here.
    w1 = jnp.concatenate([w1s, w1e], axis=1).astype(bf16)          # (D, 4D)
    b1 = jnp.concatenate([b1s, b1e]).reshape(1, -1)                # (1, 4D) f32
    w2s_b, w2e_b = w2s.astype(bf16), w2e.astype(bf16)              # (2D, D) each
    wos, woe = wo[:D].astype(bf16), wo[D:].astype(bf16)            # (D, D) halves
    b2s2, b2e2, bo2 = b2s.reshape(1, -1), b2e.reshape(1, -1), bo.reshape(1, -1)

    whole2 = lambda shape: pl.BlockSpec(shape, lambda b, kt: (0, 0))

    out = pl.pallas_call(
        functools.partial(_span_marker_kernel, D),
        out_shape=jax.ShapeDtypeStruct((B, K, D), jnp.float32),
        grid=(B, nkt),
        in_specs=[
            pl.BlockSpec((1, L, D), lambda b, kt: (b, 0, 0)),               # h
            pl.BlockSpec((1, 1, tile_k, 1), lambda b, kt: (b, kt, 0, 0)),   # start idx
            pl.BlockSpec((1, 1, tile_k, 1), lambda b, kt: (b, kt, 0, 0)),   # end idx
            whole2((D, 4 * D)),        # fused layer-1 W  [start | end]
            whole2((1, 4 * D)),        # fused layer-1 b
            whole2((2 * D, D)),        # project_start layer-2 W
            whole2((1, D)),            # project_start layer-2 b
            whole2((2 * D, D)),        # project_end layer-2 W
            whole2((1, D)),            # project_end layer-2 b
            whole2((D, D)),            # out_project W (start half)
            whole2((D, D)),            # out_project W (end half)
            whole2((1, D)),            # out_project b
        ],
        out_specs=pl.BlockSpec((1, tile_k, D), lambda b, kt: (b, kt, 0)),
        scratch_shapes=[pltpu.VMEM((L, D), jnp.bfloat16),    # start_rep (per batch)
                        pltpu.VMEM((L, D), jnp.bfloat16)],   # end_rep   (per batch)
        compiler_params=pltpu.CompilerParams(
            # K-tile axis must stay "arbitrary": the per-batch rep scratch is
            # initialized at kt == 0 and carried across K tiles.
            dimension_semantics=("parallel", "arbitrary"),
            vmem_limit_bytes=48 * 1024 * 1024),
    )(h, starts, ends, w1, b1, w2s_b, b2s2, w2e_b, b2e2, wos, woe, bo2)

    return out.reshape(B, L, max_width, D)


def init_params(key, D):
    ks = jax.random.split(key, 10)
    s = 0.05
    w1s = s * jax.random.normal(ks[0], (D, 2 * D), jnp.float32)
    b1s = s * jax.random.normal(ks[1], (2 * D,), jnp.float32)
    w2s = s * jax.random.normal(ks[2], (2 * D, D), jnp.float32)
    b2s = s * jax.random.normal(ks[3], (D,), jnp.float32)
    w1e = s * jax.random.normal(ks[4], (D, 2 * D), jnp.float32)
    b1e = s * jax.random.normal(ks[5], (2 * D,), jnp.float32)
    w2e = s * jax.random.normal(ks[6], (2 * D, D), jnp.float32)
    b2e = s * jax.random.normal(ks[7], (D,), jnp.float32)
    wo = s * jax.random.normal(ks[8], (2 * D, D), jnp.float32)
    bo = s * jax.random.normal(ks[9], (D,), jnp.float32)
    return (w1s, b1s, w2s, b2s, w1e, b1e, w2e, b2e, wo, bo)


def ref_forward(h, span_idx, params, max_width):
    # Pure-JAX (f32) reference mirroring the PyTorch forward (dropout = identity).
    B, L, D = h.shape
    K = span_idx.shape[1]
    w1s, b1s, w2s, b2s, w1e, b1e, w2e, b2e, wo, bo = params
    start_rep = jnp.maximum(h @ w1s + b1s, 0.0) @ w2s + b2s
    end_rep = jnp.maximum(h @ w1e + b1e, 0.0) @ w2e + b2e
    s_idx = jnp.broadcast_to(span_idx[:, :, 0][..., None], (B, K, D))
    e_idx = jnp.broadcast_to(span_idx[:, :, 1][..., None], (B, K, D))
    start_span = jnp.take_along_axis(start_rep, s_idx, axis=1)
    end_span = jnp.take_along_axis(end_rep, e_idx, axis=1)
    cat = jnp.maximum(jnp.concatenate([start_span, end_span], axis=-1), 0.0)
    out = cat @ wo + bo
    return out.reshape(B, L, max_width, D)


if __name__ == "__main__":
    B, L, D, W = 2, 8, 32, 4        # batch, seq, hidden, max_width
    K = L * W

    key = jax.random.PRNGKey(0)
    kh, kp = jax.random.split(key, 2)
    h = jax.random.normal(kh, (B, L, D), jnp.float32)

    # span_idx: for each position, spans of width 0..W-1 (clipped to the sequence).
    pos = jnp.repeat(jnp.arange(L, dtype=jnp.int32), W)            # (K,)
    wid = jnp.tile(jnp.arange(W, dtype=jnp.int32), L)              # (K,)
    start_idx = jnp.broadcast_to(pos, (B, K))
    end_idx = jnp.clip(start_idx + wid, 0, L - 1)
    span_idx = jnp.stack([start_idx, end_idx], axis=-1)            # (B, K, 2) int32

    params = init_params(kp, D)

    # tile_k=16 exercises the multi-K-tile path (K=32 -> 2 tiles per batch).
    out = span_marker_forward(h, span_idx, params, W, tile_k=16)
    out = jax.block_until_ready(out)
    assert out.shape == (B, L, W, D)

    ref = ref_forward(h, span_idx, params, W)
    assert jnp.allclose(out, ref, atol=1e-2, rtol=1e-2), "mismatch vs JAX reference"

    print("KERNEL_OK")
</pallas_src>

<mosaic_0001>
module attributes {stable_mosaic.version = 11 : i64} {
  func.func @_span_marker_kernel(%arg0: i32, %arg1: i32, %arg2: memref<1x8x32xf32, #tpu.memory_space<vmem>>, %arg3: memref<1x1x16x1xi32, #tpu.memory_space<vmem>>, %arg4: memref<1x1x16x1xi32, #tpu.memory_space<vmem>>, %arg5: memref<32x128xbf16, #tpu.memory_space<vmem>>, %arg6: memref<1x128xf32, #tpu.memory_space<vmem>>, %arg7: memref<64x32xbf16, #tpu.memory_space<vmem>>, %arg8: memref<1x32xf32, #tpu.memory_space<vmem>>, %arg9: memref<64x32xbf16, #tpu.memory_space<vmem>>, %arg10: memref<1x32xf32, #tpu.memory_space<vmem>>, %arg11: memref<32x32xbf16, #tpu.memory_space<vmem>>, %arg12: memref<32x32xbf16, #tpu.memory_space<vmem>>, %arg13: memref<1x32xf32, #tpu.memory_space<vmem>>, %arg14: memref<1x16x32xf32, #tpu.memory_space<vmem>>, %arg15: memref<8x32xbf16, #tpu.memory_space<vmem>>, %arg16: memref<8x32xbf16, #tpu.memory_space<vmem>>) attributes {dimension_semantics = [#tpu.dimension_semantics<parallel>, #tpu.dimension_semantics<arbitrary>], iteration_bounds = array<i64: 2, 2>, scalar_prefetch = 0 : i64, scratch_operands = 2 : i64, tpu.core_type = #tpu.core_type<tc>, window_params = [{transform_indices = @transform_0, window_bounds = array<i64: 1, 8, 32>}, {transform_indices = @transform_1, window_bounds = array<i64: 1, 1, 16, 1>}, {transform_indices = @transform_2, window_bounds = array<i64: 1, 1, 16, 1>}, {pipeline_mode = #tpu.pipeline_mode<synchronous>, transform_indices = @transform_3, window_bounds = array<i64: 32, 128>}, {pipeline_mode = #tpu.pipeline_mode<synchronous>, transform_indices = @transform_4, window_bounds = array<i64: 1, 128>}, {pipeline_mode = #tpu.pipeline_mode<synchronous>, transform_indices = @transform_5, window_bounds = array<i64: 64, 32>}, {pipeline_mode = #tpu.pipeline_mode<synchronous>, transform_indices = @transform_6, window_bounds = array<i64: 1, 32>}, {pipeline_mode = #tpu.pipeline_mode<synchronous>, transform_indices = @transform_7, window_bounds = array<i64: 64, 32>}, {pipeline_mode = #tpu.pipeline_mode<synchronous>, transform_indices = @transform_8, window_bounds = array<i64: 1, 32>}, {pipeline_mode = #tpu.pipeline_mode<synchronous>, transform_indices = @transform_9, window_bounds = array<i64: 32, 32>}, {pipeline_mode = #tpu.pipeline_mode<synchronous>, transform_indices = @transform_10, window_bounds = array<i64: 32, 32>}, {pipeline_mode = #tpu.pipeline_mode<synchronous>, transform_indices = @transform_11, window_bounds = array<i64: 1, 32>}, {transform_indices = @transform_12, window_bounds = array<i64: 1, 16, 32>}]} {
    %c0_i32 = arith.constant 0 : i32
    %0 = arith.cmpi eq, %arg1, %c0_i32 : i32
    %1 = arith.extui %0 : i1 to i32
    %c0_i32_0 = arith.constant 0 : i32
    %2 = arith.cmpi ne, %1, %c0_i32_0 : i32
    scf.if %2 {
      %c0_26 = arith.constant 0 : index
      %c0_27 = arith.constant 0 : index
      %c0_28 = arith.constant 0 : index
      %39 = vector.load %arg2[%c0_26, %c0_27, %c0_28] : memref<1x8x32xf32, #tpu.memory_space<vmem>>, vector<1x8x32xf32>
      %40 = vector.shape_cast %39 : vector<1x8x32xf32> to vector<8x32xf32>
      %41 = arith.truncf %40 : vector<8x32xf32> to vector<8x32xbf16>
      %c0_29 = arith.constant 0 : index
      %c0_30 = arith.constant 0 : index
      %42 = vector.load %arg5[%c0_29, %c0_30] : memref<32x128xbf16, #tpu.memory_space<vmem>>, vector<32x128xbf16>
      %cst_31 = arith.constant dense<0.000000e+00> : vector<8x128xf32>
      %43 = tpu.matmul %41, %42, %cst_31 {dimension_numbers = #tpu.dot_dimension_numbers<[1], [0], [0], [1], [0, 0, 1, 1], [], []>} : vector<8x32xbf16>, vector<32x128xbf16>, vector<8x128xf32> -> vector<8x128xf32>
      %c0_32 = arith.constant 0 : index
      %c0_33 = arith.constant 0 : index
      %44 = vector.load %arg6[%c0_32, %c0_33] : memref<1x128xf32, #tpu.memory_space<vmem>>, vector<1x128xf32>
      %45 = vector.broadcast %44 : vector<1x128xf32> to vector<8x128xf32>
      %46 = arith.addf %43, %45 : vector<8x128xf32>
      %cst_34 = arith.constant 0.000000e+00 : f32
      %47 = vector.broadcast %cst_34 : f32 to vector<8x128xf32>
      %48 = arith.maximumf %46, %47 : vector<8x128xf32>
      %49 = arith.truncf %48 : vector<8x128xf32> to vector<8x128xbf16>
      %50 = vector.extract_strided_slice %49 {offsets = [0, 0], sizes = [8, 64], strides = [1, 1]} : vector<8x128xbf16> to vector<8x64xbf16>
      %51 = vector.extract_strided_slice %49 {offsets = [0, 64], sizes = [8, 64], strides = [1, 1]} : vector<8x128xbf16> to vector<8x64xbf16>
      %c0_35 = arith.constant 0 : index
      %c0_36 = arith.constant 0 : index
      %52 = vector.load %arg7[%c0_35, %c0_36] : memref<64x32xbf16, #tpu.memory_space<vmem>>, vector<64x32xbf16>
      %cst_37 = arith.constant dense<0.000000e+00> : vector<8x32xf32>
      %53 = tpu.matmul %50, %52, %cst_37 {dimension_numbers = #tpu.dot_dimension_numbers<[1], [0], [0], [1], [0, 0, 1, 1], [], []>} : vector<8x64xbf16>, vector<64x32xbf16>, vector<8x32xf32> -> vector<8x32xf32>
      %c0_38 = arith.constant 0 : index
      %c0_39 = arith.constant 0 : index
      %54 = vector.load %arg8[%c0_38, %c0_39] : memref<1x32xf32, #tpu.memory_space<vmem>>, vector<1x32xf32>
      %55 = vector.broadcast %54 : vector<1x32xf32> to vector<8x32xf32>
      %56 = arith.addf %53, %55 : vector<8x32xf32>
      %c0_40 = arith.constant 0 : index
      %c0_41 = arith.constant 0 : index
      %57 = vector.load %arg9[%c0_40, %c0_41] : memref<64x32xbf16, #tpu.memory_space<vmem>>, vector<64x32xbf16>
      %cst_42 = arith.constant dense<0.000000e+00> : vector<8x32xf32>
      %58 = tpu.matmul %51, %57, %cst_42 {dimension_numbers = #tpu.dot_dimension_numbers<[1], [0], [0], [1], [0, 0, 1, 1], [], []>} : vector<8x64xbf16>, vector<64x32xbf16>, vector<8x32xf32> -> vector<8x32xf32>
      %c0_43 = arith.constant 0 : index
      %c0_44 = arith.constant 0 : index
      %59 = vector.load %arg10[%c0_43, %c0_44] : memref<1x32xf32, #tpu.memory_space<vmem>>, vector<1x32xf32>
      %60 = vector.broadcast %59 : vector<1x32xf32> to vector<8x32xf32>
      %61 = arith.addf %58, %60 : vector<8x32xf32>
      %62 = arith.truncf %56 : vector<8x32xf32> to vector<8x32xbf16>
      %c0_45 = arith.constant 0 : index
      %c0_46 = arith.constant 0 : index
      %63 = vector.load %arg15[%c0_45, %c0_46] : memref<8x32xbf16, #tpu.memory_space<vmem>>, vector<8x32xbf16>
      tpu.vector_store %arg15[%c0_45, %c0_46], %62 {strides = array<i32>} : memref<8x32xbf16, #tpu.memory_space<vmem>>, vector<8x32xbf16>,
      %64 = arith.truncf %61 : vector<8x32xf32> to vector<8x32xbf16>
      %c0_47 = arith.constant 0 : index
      %c0_48 = arith.constant 0 : index
      %65 = vector.load %arg16[%c0_47, %c0_48] : memref<8x32xbf16, #tpu.memory_space<vmem>>, vector<8x32xbf16>
      tpu.vector_store %arg16[%c0_47, %c0_48], %64 {strides = array<i32>} : memref<8x32xbf16, #tpu.memory_space<vmem>>, vector<8x32xbf16>,
    } else {
    }
    %c0 = arith.constant 0 : index
    %c0_1 = arith.constant 0 : index
    %c0_2 = arith.constant 0 : index
    %c0_3 = arith.constant 0 : index
    %3 = vector.load %arg3[%c0, %c0_1, %c0_2, %c0_3] : memref<1x1x16x1xi32, #tpu.memory_space<vmem>>, vector<1x1x16x1xi32>
    %4 = vector.shape_cast %3 : vector<1x1x16x1xi32> to vector<16x1xi32>
    %c0_4 = arith.constant 0 : index
    %c0_5 = arith.constant 0 : index
    %c0_6 = arith.constant 0 : index
    %c0_7 = arith.constant 0 : index
    %5 = vector.load %arg4[%c0_4, %c0_5, %c0_6, %c0_7] : memref<1x1x16x1xi32, #tpu.memory_space<vmem>>, vector<1x1x16x1xi32>
    %6 = vector.shape_cast %5 : vector<1x1x16x1xi32> to vector<16x1xi32>
    %7 = tpu.iota {dimensions = array<i32: 1>} : vector<16x8xi32>
    %8 = vector.broadcast %4 : vector<16x1xi32> to vector<16x8xi32>
    %9 = arith.cmpi eq, %7, %8 : vector<16x8xi32>
    %10 = arith.extui %9 : vector<16x8xi1> to vector<16x8xi32>
    %11 = arith.sitofp %10 : vector<16x8xi32> to vector<16x8xf32>
    %12 = arith.truncf %11 : vector<16x8xf32> to vector<16x8xbf16>
    %13 = vector.broadcast %6 : vector<16x1xi32> to vector<16x8xi32>
    %14 = arith.cmpi eq, %7, %13 : vector<16x8xi32>
    %15 = arith.extui %14 : vector<16x8xi1> to vector<16x8xi32>
    %16 = arith.sitofp %15 : vector<16x8xi32> to vector<16x8xf32>
    %17 = arith.truncf %16 : vector<16x8xf32> to vector<16x8xbf16>
    %c0_8 = arith.constant 0 : index
    %c0_9 = arith.constant 0 : index
    %18 = vector.load %arg15[%c0_8, %c0_9] : memref<8x32xbf16, #tpu.memory_space<vmem>>, vector<8x32xbf16>
    %cst = arith.constant dense<0.000000e+00> : vector<16x32xf32>
    %19 = tpu.matmul %12, %18, %cst {dimension_numbers = #tpu.dot_dimension_numbers<[1], [0], [0], [1], [0, 0, 1, 1], [], []>} : vector<16x8xbf16>, vector<8x32xbf16>, vector<16x32xf32> -> vector<16x32xf32>
    %c0_10 = arith.constant 0 : index
    %c0_11 = arith.constant 0 : index
    %20 = vector.load %arg16[%c0_10, %c0_11] : memref<8x32xbf16, #tpu.memory_space<vmem>>, vector<8x32xbf16>
    %cst_12 = arith.constant dense<0.000000e+00> : vector<16x32xf32>
    %21 = tpu.matmul %17, %20, %cst_12 {dimension_numbers = #tpu.dot_dimension_numbers<[1], [0], [0], [1], [0, 0, 1, 1], [], []>} : vector<16x8xbf16>, vector<8x32xbf16>, vector<16x32xf32> -> vector<16x32xf32>
    %cst_13 = arith.constant 0.000000e+00 : f32
    %22 = vector.broadcast %cst_13 : f32 to vector<16x32xf32>
    %23 = arith.maximumf %19, %22 : vector<16x32xf32>
    %24 = arith.truncf %23 : vector<16x32xf32> to vector<16x32xbf16>
    %cst_14 = arith.constant 0.000000e+00 : f32
    %25 = vector.broadcast %cst_14 : f32 to vector<16x32xf32>
    %26 = arith.maximumf %21, %25 : vector<16x32xf32>
    %27 = arith.truncf %26 : vector<16x32xf32> to vector<16x32xbf16>
    %c0_15 = arith.constant 0 : index
    %c0_16 = arith.constant 0 : index
    %28 = vector.load %arg11[%c0_15, %c0_16] : memref<32x32xbf16, #tpu.memory_space<vmem>>, vector<32x32xbf16>
    %cst_17 = arith.constant dense<0.000000e+00> : vector<16x32xf32>
    %29 = tpu.matmul %24, %28, %cst_17 {dimension_numbers = #tpu.dot_dimension_numbers<[1], [0], [0], [1], [0, 0, 1, 1], [], []>} : vector<16x32xbf16>, vector<32x32xbf16>, vector<16x32xf32> -> vector<16x32xf32>
    %c0_18 = arith.constant 0 : index
    %c0_19 = arith.constant 0 : index
    %30 = vector.load %arg12[%c0_18, %c0_19] : memref<32x32xbf16, #tpu.memory_space<vmem>>, vector<32x32xbf16>
    %cst_20 = arith.constant dense<0.000000e+00> : vector<16x32xf32>
    %31 = tpu.matmul %27, %30, %cst_20 {dimension_numbers = #tpu.dot_dimension_numbers<[1], [0], [0], [1], [0, 0, 1, 1], [], []>} : vector<16x32xbf16>, vector<32x32xbf16>, vector<16x32xf32> -> vector<16x32xf32>
    %32 = arith.addf %29, %31 : vector<16x32xf32>
    %c0_21 = arith.constant 0 : index
    %c0_22 = arith.constant 0 : index
    %33 = vector.load %arg13[%c0_21, %c0_22] : memref<1x32xf32, #tpu.memory_space<vmem>>, vector<1x32xf32>
    %34 = vector.broadcast %33 : vector<1x32xf32> to vector<16x32xf32>
    %35 = arith.addf %32, %34 : vector<16x32xf32>
    %c0_23 = arith.constant 0 : index
    %c0_24 = arith.constant 0 : index
    %c0_25 = arith.constant 0 : index
    %36 = vector.load %arg14[%c0_23, %c0_24, %c0_25] : memref<1x16x32xf32, #tpu.memory_space<vmem>>, vector<1x16x32xf32>
    %37 = vector.shape_cast %36 : vector<1x16x32xf32> to vector<16x32xf32>
    %38 = vector.shape_cast %35 : vector<16x32xf32> to vector<1x16x32xf32>
    tpu.vector_store %arg14[%c0_23, %c0_24, %c0_25], %38 {strides = array<i32>} : memref<1x16x32xf32, #tpu.memory_space<vmem>>, vector<1x16x32xf32>,
    return
  }
  func.func @transform_0(%arg0: i32, %arg1: i32) -> (i32, i32, i32) {
    %c0_i32 = arith.constant 0 : i32
    %c0_i32_0 = arith.constant 0 : i32
    %c0_i32_1 = arith.constant 0 : i32
    return %arg0, %c0_i32, %c0_i32_0 : i32, i32, i32
  }
  func.func @transform_1(%arg0: i32, %arg1: i32) -> (i32, i32, i32, i32) {
    %c0_i32 = arith.constant 0 : i32
    %c0_i32_0 = arith.constant 0 : i32
    %c0_i32_1 = arith.constant 0 : i32
    return %arg0, %arg1, %c0_i32, %c0_i32_0 : i32, i32, i32, i32
  }
  func.func @transform_2(%arg0: i32, %arg1: i32) -> (i32, i32, i32, i32) {
    %c0_i32 = arith.constant 0 : i32
    %c0_i32_0 = arith.constant 0 : i32
    %c0_i32_1 = arith.constant 0 : i32
    return %arg0, %arg1, %c0_i32, %c0_i32_0 : i32, i32, i32, i32
  }
  func.func @transform_3(%arg0: i32, %arg1: i32) -> (i32, i32) {
    %c0_i32 = arith.constant 0 : i32
    %c0_i32_0 = arith.constant 0 : i32
    %c0_i32_1 = arith.constant 0 : i32
    return %c0_i32, %c0_i32_0 : i32, i32
  }
  func.func @transform_4(%arg0: i32, %arg1: i32) -> (i32, i32) {
    %c0_i32 = arith.constant 0 : i32
    %c0_i32_0 = arith.constant 0 : i32
    %c0_i32_1 = arith.constant 0 : i32
    return %c0_i32, %c0_i32_0 : i32, i32
  }
  func.func @transform_5(%arg0: i32, %arg1: i32) -> (i32, i32) {
    %c0_i32 = arith.constant 0 : i32
    %c0_i32_0 = arith.constant 0 : i32
    %c0_i32_1 = arith.constant 0 : i32
    return %c0_i32, %c0_i32_0 : i32, i32
  }
  func.func @transform_6(%arg0: i32, %arg1: i32) -> (i32, i32) {
    %c0_i32 = arith.constant 0 : i32
    %c0_i32_0 = arith.constant 0 : i32
    %c0_i32_1 = arith.constant 0 : i32
    return %c0_i32, %c0_i32_0 : i32, i32
  }
  func.func @transform_7(%arg0: i32, %arg1: i32) -> (i32, i32) {
    %c0_i32 = arith.constant 0 : i32
    %c0_i32_0 = arith.constant 0 : i32
    %c0_i32_1 = arith.constant 0 : i32
    return %c0_i32, %c0_i32_0 : i32, i32
  }
  func.func @transform_8(%arg0: i32, %arg1: i32) -> (i32, i32) {
    %c0_i32 = arith.constant 0 : i32
    %c0_i32_0 = arith.constant 0 : i32
    %c0_i32_1 = arith.constant 0 : i32
    return %c0_i32, %c0_i32_0 : i32, i32
  }
  func.func @transform_9(%arg0: i32, %arg1: i32) -> (i32, i32) {
    %c0_i32 = arith.constant 0 : i32
    %c0_i32_0 = arith.constant 0 : i32
    %c0_i32_1 = arith.constant 0 : i32
    return %c0_i32, %c0_i32_0 : i32, i32
  }
  func.func @transform_10(%arg0: i32, %arg1: i32) -> (i32, i32) {
    %c0_i32 = arith.constant 0 : i32
    %c0_i32_0 = arith.constant 0 : i32
    %c0_i32_1 = arith.constant 0 : i32
    return %c0_i32, %c0_i32_0 : i32, i32
  }
  func.func @transform_11(%arg0: i32, %arg1: i32) -> (i32, i32) {
    %c0_i32 = arith.constant 0 : i32
    %c0_i32_0 = arith.constant 0 : i32
    %c0_i32_1 = arith.constant 0 : i32
    return %c0_i32, %c0_i32_0 : i32, i32
  }
  func.func @transform_12(%arg0: i32, %arg1: i32) -> (i32, i32, i32) {
    %c0_i32 = arith.constant 0 : i32
    %c0_i32_0 = arith.constant 0 : i32
    return %arg0, %arg1, %c0_i32 : i32, i32, i32
  }
}

</mosaic_0001>

<bundles_post_ra>
// kernel: tpu_custom_call.1
= control target key start
LH: loop header
LB: loop body
LE: loop exit
PB: predicated region body
PF: predicated region fallthrough
CT: control target
= control target key end

     0   :  { %s1499_s0 = inlined_call_operand.vmem [shape: f32[2,8,32], index: 0, kind: input, shape index: {}]   ;;  %s1500_s1 = inlined_call_operand.vmem [shape: s32[2,2,16,1], index: 1, kind: input, shape index: {}]   ;;  %s1501_s2 = inlined_call_operand.vmem [shape: s32[2,2,16,1], index: 2, kind: input, shape index: {}]   ;;  %s1502_s3 = inlined_call_operand.vmem [shape: bf16[32,128], index: 3, kind: input, shape index: {}]   ;;  %s1503_s4 = inlined_call_operand.vmem [shape: f32[1,128], index: 4, kind: input, shape index: {}]   ;;  %s1504_s5 = inlined_call_operand.vmem [shape: bf16[64,32], index: 5, kind: input, shape index: {}]   ;;  %s1505_s6 = inlined_call_operand.vmem [shape: f32[1,32], index: 6, kind: input, shape index: {}]   ;;  %s1506_s7 = inlined_call_operand.vmem [shape: bf16[64,32], index: 7, kind: input, shape index: {}]   ;;  %s1507_s8 = inlined_call_operand.vmem [shape: f32[1,32], index: 8, kind: input, shape index: {}]   ;;  %s1508_s9 = inlined_call_operand.vmem [shape: bf16[32,32], index: 9, kind: input, shape index: {}]   ;;  %s1509_s10 = inlined_call_operand.vmem [shape: bf16[32,32], index: 10, kind: input, shape index: {}]   ;;  %s1510_s11 = inlined_call_operand.vmem [shape: f32[1,32], index: 11, kind: input, shape index: {}]   ;;  %s1511_s12 = inlined_call_operand.hbm [shape: f32[2,32,32], index: 12, kind: output, shape index: {}]  }
   0x1   :  { %1526 = sst [smem:[#allocation18_spill]] %s1510_s11 }
   0x2   :  { %1527 = sst [smem:[#allocation19_spill]] %s1511_s12 }
   0x3   :  { %17 = vsyncpa [#allocation5], 0 }
   0x4   :  { %19 = vsyncpa [#allocation5 + $0x1], 0  ;;  %s1295_s21 = smov 0   ;;  %s1297_s22 = smov 0  }
   0x5   :  { %s1299_s23 = smov 0   ;;  %s1301_s24 = smov 0  }
   0x6   :  { %s1303_s25 = smov 0   ;;  %s1305_s26 = smov 0  }
   0x7   :  { %s1307_s27 = smov 0   ;;  %s1309_s28 = smov 0  }
   0x8 LB: > { %1528 = sst [smem:[#allocation7_spill]] %s1195_s21  ;;  %s946_s29 = sadd.s32 4294967295, %s1223_s28   ;;  %s1223_s28 = sphi %s1309_s28, %s25_s28   ;;  %s1219_s27 = sphi %s1307_s27, %s1555_s27   ;;  %s1215_s26 = sphi %s1305_s26, %s1554_s26   ;;  %s1211_s25 = sphi %s1303_s25, %s1553_s25   ;;  %s1207_s24 = sphi %s1301_s24, %s1552_s24   ;;  %s1203_s23 = sphi %s1299_s23, %s1551_s23   ;;  %s1199_s22 = sphi %s1297_s22, %s1550_s22   ;;  %s1195_s21 = sphi %s1295_s21, %s1549_s21  }
   0x9   : > { %1529 = sst [smem:[#allocation8_spill]] %s1199_s22  ;;  %s947_s30 = sadd.s32 4294967294, %s1223_s28  }
   0xa   : > { %1530 = sst [smem:[#allocation9_spill]] %s1203_s23  ;;  %s34_s13 = sadd.s32 1, %s1215_s26 }
   0xb   : > { %1531 = sst [smem:[#allocation10_spill]] %s1215_s26  ;;  %p35_p0 = scmp.ge.s32.totalorder %s34_s13, 2 }
   0xc   : > { %1532 = sst [smem:[#allocation11_spill]] %s1219_s27  ;;  %s37_s14 = sadd.s32 1, %s1219_s27 }
   0xd   : > { %1533 = sst [smem:[#allocation12_spill]] %s1223_s28  ;;  %p327_p1 = scmp.ne.s32.totalorder %s1203_s23, %s1199_s22 }
   0xe   : > { %p328_p2 = scmp.eq.s32.totalorder %s946_s29, 3  ;;  %s1557_s13 = smov (%p35_p0, %s34_s13), 0 }
   0xf   : > { %1534 = sst [smem:[#allocation13_spill]] %s1557_s13  ;;  %s1559_s14 = smov (!%p35_p0, %s37_s14), %s1219_s27 }
  0x10   : > { %s313_s15 = ssub.s32 %s1215_s26, %s1557_s13  ;;  %p1346_p3 = por %p328_p2, %p327_p1 }
  0x11   : > { %p39_p4 = scmp.ge.s32.totalorder %s1559_s14, 2  ;;  %p333_p5 = scmp.ne.s32.totalorder %s1199_s22, %s1195_s21 }
  0x12   : > { %s1535_s16 = scalar_select %p1346_p3, 1, 0 }
  0x13   : > { %p334_p6 = scmp.eq.s32.totalorder %s947_s30, 3  ;;  %p950_p7 = scmp.ge.s32.totalorder %s1223_s28, 1 }
  0x14   : > { %1536 = sst [smem:[#allocation14_spill]] %s1535_s16  ;;  %s1561_s14 = smov (%p39_p4, %s1559_s14), 0 }
  0x15   : > { %1537 = sst [smem:[#allocation15_spill]] %s1561_s14  ;;  %p1355_p8 = por %p334_p6, %p333_p5 }
  0x16   : > { %p410_p9 = scmp.lt.s32.totalorder %s1223_s28, 5  ;;  %s312_s18 = ssub.s32 %s1219_s27, %s1561_s14 }
  0x17   : > { %s1538_s17 = scalar_select %p1355_p8, 1, 0 }
  0x18   : > { %s317_s19 = sadd.s32 1, %s1203_s23  ;;  %s314_s20 = sor.u32 %s313_s15, %s312_s18 }
  0x19   : > { %1539 = sst [smem:[#allocation16_spill]] %s1538_s17  ;;  %p411_p10 = pnand %p950_p7, %p410_p9 }
  0x1a   : > { %p315_p11 = scmp.eq.s32.totalorder %s314_s20, 0  ;;  %s1525_s30 = sand.u32 (!%p411_p10), 1, %s1199_s22  }
  0x1b   : > { %414 = sbr.rel (%p411_p10) target bundleno = 855 (0x357), region = 68  ;;  %p469_p12 = scmp.lt.s32.totalorder (!%p411_p10), %s1211_s25, 1 }
  0x1c   : > { %s1364_s29 = scalar_select %p315_p11, %s1203_s23, %s317_s19  }
  0x1d   : > { %s951_s13 = sshll.u32 (!%p411_p10), %s1525_s30, 4  ;;  %p475_p13 = scmp.lt.s32.totalorder (!%p411_p10), %s1207_s24, 1 }
  0x1e   : > { %1540 = sst [smem:[#allocation17_spill]] %s1364_s29  ;;  %s1386_s11 = scalar_lea.vmem (!%p411_p10), [#allocation4], %s951_s13 }
  0x1f   : > { %p959_p0 = scmp.ne.s32.totalorder (!%p411_p10), %s1207_s24, 0 }
  0x20   : > { %s470_s26 = scalar_select %p469_p12, %s1211_s25, 1 }
  0x21   : > { %s476_s14 = scalar_select %p475_p13, %s1207_s24, 1 }
  0x22   : > { %s952_s27 = sshll.u32 %s470_s26, 3  ;;  %s954_s15 = sshll.u32 %s470_s26, 2 }
  0x23   : > { %s472_s19 = scalar_lea.vmem %s1499_s0, %s952_s27  ;;  %s953_s29 = sshll.u32 %s476_s14, 1 }
  0x24   : > { %s479_s23 = sadd.s32 %s954_s15, %s953_s29  ;;  %496 = sbr.rel (%p959_p0) target bundleno = 440 (0x1b8), region = 72 }
  0x25   : > { %s955_s17 = sshll.u32 %s479_s23, 3  ;;  %s1225_s22 = smov (!%p959_p0), 64  }
  0x26   : > { %s1379_s16 = scalar_lea.vmem %s1500_s1, %s955_s17  ;;  %s1384_s30 = scalar_lea.vmem %s1501_s2, %s955_s17 }
  0x29   : > { %v1034_v0 = vld [vmem:[%s1502_s3 + $0x8] sm:$0xff]  ;;  %v1033_v1 = vld [vmem:[%s1502_s3] sm:$0xff]  ;;  %v1038_v2 = vld [vmem:[%s1504_s5 + $0x18] sm:$0xff]  ;;  %vm519_vm0 = vcmask 261120   ;;  %vm574_vm1 = vcmask 523264   ;;  %vm649_vm2 = vcmask 257024  }
  0x2a   : > { %529 = vmatpush.bf16.msra.mxu0 %v1034_v0  ;;  %v497_v3 = vld [vmem:[%s472_s19] sm:$0xff]  ;;  %582 = vmatpush.bf16.msra.mxu1 %v1038_v2  ;;  %v1037_v4 = vld [vmem:[%s1504_s5 + $0x10] sm:$0xff]  ;;  %v1036_v6 = vld [vmem:[%s1504_s5 + $0x8] sm:$0xff] }
  0x2b   : > { %v498_v5 = vpack.c.bf16 %v497_v3, %v497_v3  ;;  %v1035_v7 = vld [vmem:[%s1504_s5] sm:$0xff]  ;;  %v1042_v8 = vld [vmem:[%s1506_s7 + $0x18] sm:$0xff]  ;;  %v1041_v9 = vld [vmem:[%s1506_s7 + $0x10] sm:$0xff] }
  0x2c   : > { %639 = vmatpush.bf16.msra.mxu2 %v1042_v8  ;;  %v1040_v10 = vld [vmem:[%s1506_s7 + $0x8] sm:$0xff]  ;;  %v1039_v11 = vld [vmem:[%s1506_s7] sm:$0xff] }
  0x2d   : > { %v1123_v12 = vld [vmem:[%s1503_s4] ss:$0 sm:$0xff] }
  0x2e   : > { %530 = vmatpush.bf16.msra.mxu0 %v1033_v1  ;;  %583 = vmatpush.bf16.msra.mxu1 %v1037_v4  ;;  %v1124_v21 = vld [vmem:[%s1505_s6] ss:$0 sm:$0xff] }
  0x2f   : > { %v1125_v26 = vld [vmem:[%s1507_s8] ss:$0 sm:$0xff] }
  0x30   : > { %640 = vmatpush.bf16.msra.mxu2 %v1041_v9 }
  0x31   : > { %968 = vmatmul.msk.bf16.vlgmr.msra.gmra.mxu0 %vm519_vm0, %v498_v5 }
  0x32   : > { %584 = vmatpush.bf16.msra.mxu1 %v1036_v6 }
  0x34   : > { %641 = vmatpush.bf16.msra.mxu2 %v1040_v10 }
  0x36   : > { %585 = vmatpush.bf16.msra.mxu1 %v1035_v7 }
  0x38   : > { %642 = vmatpush.bf16.msra.mxu2 %v1039_v11 }
  0xae   : > { %v532_v13 = vpop.f32.mrf.mxu0 }
  0xaf   : > { %v533_v14 = vadd.f32 %v1123_v12, %v532_v13 }
  0xb1   : > { %v536_v15 = vmax.f32 %v533_v14, 0.0 }
  0xb3   : > { %v537_v16 = vpack.c.bf16 %v536_v15, %v536_v15 }
  0xb5   : > { %985 = vmatmul.msk.bf16.vlgmr.msra.gmra.mxu1 %vm574_vm1, %v537_v16  ;;  %v604_v17 = vunpack.c.l.b16 %v537_v16 }
  0xb6   : > { %v534_v18 = vpop.f32.mrf.mxu0 }
  0xb7   : > { %v605_v19 = vpack.c.b16 %v604_v17, %v604_v17 }
  0xb9   : > { %606 = vrot.lane.b32.xlu0 %v605_v19, %s1225_s22 }
 0x12b   : > { %v607_v20 = vpop.permute.xlu0 %606 }
 0x12c   : > { %1002 = vmatmul.msk.bf16.vlgmr.msra.gmra.mxu2 %vm574_vm1, %v607_v20 }
 0x132   : > { %v587_v22 = vpop.f32.mrf.mxu1 }
 0x133   : > { %v588_v23 = vadd.f32 %v1124_v21, %v587_v22 }
 0x135   : > { %v648_v24 = vpack.c.bf16 %v588_v23, %v588_v23 }
 0x137   : > { %650 = vst.msk [vmem:[#allocation2] sm:$0xf] %vm649_vm2, %v648_v24 }
 0x13a   : > { %v589_v25 = vpop.f32.mrf.mxu1 }
 0x1af   : > { %v644_v27 = vpop.f32.mrf.mxu2 }
 0x1b0   : > { %v645_v28 = vadd.f32 %v1125_v26, %v644_v27 }
 0x1b2   : > { %v651_v29 = vpack.c.bf16 %v645_v28, %v645_v28 }
 0x1b4   : > { %652 = vst.msk [vmem:[#allocation3] sm:$0xf] %vm649_vm2, %v651_v29 }
 0x1b7   : > { %v646_v30 = vpop.f32.mrf.mxu2 }
 0x1b8 PF: > { %v655_v31 = vld [vmem:[%s1384_s30] sm:$0xff]  ;;  %v1226_v33 = vmov 0   ;;  %v656_v34 = vld [vmem:[%s1384_s30 + $0x8] sm:$0xff]  ;;  %vm690_vm3 = vcmask 1043456   ;;  %v657_v40 = vlaneseq  ;;  %vm686_vm8 = vcmask 64512   ;;  %s1028_s14 = sshll.u32 %s1207_s24, 1 }
 0x1b9   : > { %v653_v32 = vld [vmem:[%s1379_s16] sm:$0xff]  ;;  %1127 = vset.pattern.permute.xlu1 %v1226_v33  ;;  %1126 = vset.pattern.permute.xlu0 %v1226_v33  ;;  %v654_v35 = vld [vmem:[%s1379_s16 + $0x8] sm:$0xff]  ;;  %v1227_v46 = vmov 0.0   ;;  %vm755_vm9 = vcmask 261120   ;;  %s1029_s21 = sshll.u32 %s1211_s25, 2  ;;  %s1541_s13 = sld [smem:[#allocation18_spill]] }
 0x1ba   : > { %673 = vperm.xlu1 %1127, %v655_v31   ;;  %660 = vperm.xlu0 %1126, %v653_v32   ;;  %v685_v36 = vld [vmem:[#allocation2] sm:$0xf]  ;;  %v658_v43 = vand.u32 127, %v657_v40  ;;  %v1046_v53 = vld [vmem:[%s1509_s10 + $0x8] sm:$0xff]  ;;  %s822_s28 = sadd.s32 %s1029_s21, %s1028_s14  ;;  %s1542_s17 = sld [smem:[#allocation8_spill]] }
 0x1bb   : > { %v708_v37 = vld [vmem:[#allocation3] sm:$0xf]  ;;  %v692_v38 = vsel %vm690_vm3, %v685_v36, 0  ;;  %v1044_v54 = vld [vmem:[%s1508_s9 + $0x8] sm:$0xff]  ;;  %765 = vmatpush.bf16.msra.mxu2 %v1046_v53  ;;  %s1030_s29 = sshll.u32 %s822_s28, 3  ;;  %s1543_s30 = sld [smem:[#allocation19_spill]] }
 0x1bc   : > { %v713_v39 = vsel %vm690_vm3, %v708_v37, 0  ;;  %701 = vmatpush.bf16.msra.mxu0 %v692_v38  ;;  %794 = vmatpush.bf16.msra.mxu3 %v1044_v54  ;;  %v1045_v55 = vld [vmem:[%s1509_s10] sm:$0xff]  ;;  %s825_s24 = sshll.u32 %s1386_s11, 4  ;;  %s826_s24 = int_to_ptr.vmem [resolvable:$true] %s825_s24 }
 0x1bd   : > { %722 = vmatpush.bf16.msra.mxu1 %v713_v39  ;;  %v1043_v56 = vld [vmem:[%s1508_s9] sm:$0xff] }
 0x1bf   : > { %766 = vmatpush.bf16.msra.mxu2 %v1045_v55  ;;  %v1128_v3 = vld [vmem:[%s1541_s13] ss:$0 sm:$0xff] }
 0x1c0   : > { %795 = vmatpush.bf16.msra.mxu3 %v1043_v56  ;;  %s1545_s19 = sand.u32 1, %s1542_s17  }
 0x1c1   : > { %s824_s18 = scalar_lea.hbm %s1543_s30, %s1030_s29  ;;  %s811_s26 = scalar_lea.sflag [#allocation5], %s1545_s19 }
 0x1c2   : > { %676 = vperm.xlu1 %1127, %v656_v34   ;;  %663 = vperm.xlu0 %1126, %v654_v35   ;;  %s827_s25 = sshll.u32 %s824_s18, 4  ;;  %s1149_s28 = scalar_lea.hbm %s1543_s30, 64  ;;  %s828_s25 = int_to_ptr.hbm [resolvable:$true] %s827_s25 }
 0x1c3   : > { %s1143_s27 = sshra.s32 %s828_s25, 4  ;;  %s1144_s27 = int_to_ptr.hbm [resolvable:$true] %s1143_s27 }
 0x1c4   : > { %s1145_s23 = scalar_lea.hbm %s1144_s27, 16  ;;  %p1150_p5 = scmp.lt.s32.totalorder %s1144_s27, %s1543_s30 }
 0x1c5   : > { %p1146_p1 = scmp.ne.s32.totalorder %s1144_s27, %s1145_s23  ;;  %p1151_p6 = scmp.lt.s32.totalorder %s1149_s28, %s1145_s23 }
 0x1c7   : > { %p1147_p2 = pnand %p1146_p1, %p1346_p3  ;;  %p1152_p7 = por %p1151_p6, %p1150_p5 }
 0x1c9   : > { %p1148_p4 = pneg %p1147_p2 }
 0x1cb   : > { %p1153_p9 = pnand %p1152_p7, %p1148_p4 }
 0x22c   : > { %v674_v41 = vpop.permute.xlu1 %673  ;;  %v661_v42 = vpop.permute.xlu0 %660 }
 0x22d   : > { %vm678_vm4 = vcmp.eq.s32.totalorder %v658_v43, %v674_v41  ;;  %vm665_vm5 = vcmp.eq.s32.totalorder %v658_v43, %v661_v42 }
 0x22e   : > { %v1005_v47 = vsel %vm678_vm4, 1.0, %v1227_v46  ;;  %v1003_v48 = vsel %vm665_vm5, 1.0, %v1227_v46 }
 0x234   : > { %v677_v44 = vpop.permute.xlu1 %676  ;;  %v664_v45 = vpop.permute.xlu0 %663 }
 0x235   : > { %vm679_vm6 = vcmp.eq.s32.totalorder %v658_v43, %v677_v44  ;;  %vm666_vm7 = vcmp.eq.s32.totalorder %v658_v43, %v664_v45 }
 0x236   : > { %v1006_v49 = vsel %vm679_vm6, 1.0, %v1227_v46  ;;  %v1004_v50 = vsel %vm666_vm7, 1.0, %v1227_v46 }
 0x237   : > { %v684_v51 = vpack.c.bf16 %v1006_v49, %v1005_v47  ;;  %v671_v52 = vpack.c.bf16 %v1004_v50, %v1003_v48 }
 0x239   : > { %1007 = vmatmul.msk.bf16.vlgmr.msra.gmra.mxu0 %vm686_vm8, %v671_v52  ;;  %1008 = vmatmul.msk.bf16.vlgmr.msra.gmra.mxu1 %vm686_vm8, %v684_v51 }
 0x2b6   : > { %v703_v57 = vpop.f32.mrf.mxu0  ;;  %v724_v58 = vpop.f32.mrf.mxu1 }
 0x2b7   : > { %v729_v61 = vmax.f32 %v703_v57, 0.0  ;;  %v732_v62 = vmax.f32 %v724_v58, 0.0 }
 0x2be   : > { %v705_v59 = vpop.f32.mrf.mxu0  ;;  %v726_v60 = vpop.f32.mrf.mxu1 }
 0x2bf   : > { %v730_v63 = vmax.f32 %v705_v59, 0.0  ;;  %v733_v0 = vmax.f32 %v726_v60, 0.0 }
 0x2c1   : > { %v731_v1 = vpack.c.bf16 %v730_v63, %v729_v61  ;;  %v734_v2 = vpack.c.bf16 %v733_v0, %v732_v62 }
 0x2c3   : > { %1017 = vmatmul.msk.bf16.vlgmr.msra.gmra.mxu2 %vm755_vm9, %v734_v2  ;;  %1026 = vmatmul.msk.bf16.vlgmr.msra.gmra.mxu3 %vm755_vm9, %v731_v1 }
 0x346   : > { %v768_v4 = vpop.f32.mrf.mxu2  ;;  %v797_v5 = vpop.f32.mrf.mxu3 }
 0x347   : > { %v798_v6 = vadd.f32 %v797_v5, %v768_v4 }
 0x349   : > { %v806_v7 = vadd.f32 %v1128_v3, %v798_v6 }
 0x34b   : > { %808 = vst.msk [vmem:[%s1386_s11] sm:$0xff] %vm755_vm9, %v806_v7 }
 0x34e   : > { %v770_v8 = vpop.f32.mrf.mxu2  ;;  %v799_v9 = vpop.f32.mrf.mxu3 }
 0x34f   : > { %v800_v10 = vadd.f32 %v799_v9, %v770_v8 }
 0x351   : > { %v807_v11 = vadd.f32 %v1128_v3, %v800_v10 }
 0x353   : > { %809 = vst.msk [vmem:[%s1386_s11 + $0x8] sm:$0xff] %vm755_vm9, %v807_v11 }
 0x354   : > { %1156 = shalt.err (!%p1153_p9)
}
 0x355   : > { %s1228_s11 = smov 128   ;;  %s1229_s13 = smov 8  }
 0x356   : > { %1047 = dma.vmem_to_hbm [thread:$0]  (%p1346_p3), %s826_s24, 256, %s828_s25, %s811_s26, %s1228_s11, %s1228_s11, %s1229_s13  }
 0x357 PF: > { %s1546_s17 = sld [smem:[#allocation12_spill]] }
 0x358   : > { %s1547_s29 = sld [smem:[#allocation7_spill]] }
 0x35d   : > { %p1053_p10 = scmp.ge.s32.totalorder %s1546_s17, 2 }
 0x35e   : > { %s842_s16 = sand.u32 1, %s1547_s29  }
 0x35f   : > { %p1050_p11 = pnand %p1053_p10, %p1355_p8  ;;  %s843_s18 = scalar_lea.sflag [#allocation5], %s842_s16 }
 0x361   : > { %p1051_p12 = pneg %p1050_p11 }
 0x363   : > { %1190 = dma.done.wait (%p1051_p12), %s843_s18, 256  }
 0x364   : > { %1192 = vsyncadd (%p1051_p12), %s843_s18, 4294967040  ;;  %s25_s28 = sadd.s32 1, %s1546_s17   ;;  %s1549_s21 = sld [smem:[#allocation8_spill]] }
 0x365   : > { %p22_p13 = scmp.ge.s32.totalorder %s25_s28, 6   ;;  %s1550_s22 = sld [smem:[#allocation9_spill]] }
 0x366   : > { %s1551_s23 = sld [smem:[#allocation17_spill]] }
 0x367   : > { %s1552_s24 = sld [smem:[#allocation10_spill]]  ;;  %24 = sbr.rel (!%p22_p13) target bundleno = 8 (0x8), region = 113 }
 0x368   : > { %s1553_s25 = sld [smem:[#allocation11_spill]] }
 0x369   : > { %s1554_s26 = sld [smem:[#allocation13_spill]] }
 0x36a   : > { %s1555_s27 = sld [smem:[#allocation15_spill]] }
 0x36c   :  { %849 = vsyncpa [#allocation5], 1 }
 0x36d   :  { %851 = vsyncpa [#allocation5 + $0x1], 1 }

</bundles_post_ra>
